<compile_context>
chip_gen: v6e
topology: v6e:2x2x1
jax: 0.10.0
libtpu: 0.0.40
codegen_flags: <defaults>
</compile_context>

<pallas_src>
import math
from functools import partial

import numpy as np

import jax
import jax.numpy as jnp
from jax.experimental import pallas as pl
from jax.experimental.pallas import tpu as pltpu


# -----------------------------------------------------------------------------
# Per-generation matmul configuration
# -----------------------------------------------------------------------------
def _tpu_mm_config():
    try:
        kind = jax.devices()[0].device_kind.lower()
    except Exception:
        kind = ""
    if ("v5" in kind) or ("v6" in kind):
        # 128 MiB physical VMEM: larger K strips / deeper tiles, raised scoped limit.
        return dict(budget=48 * 1024 * 1024, vmem_limit=96 * 1024 * 1024,
                    tm_cap=512, tn_cap=2048, tk_cap=2048)
    # v7x (64 MiB VMEM per TC) and unknown chips: conservative footprint.
    return dict(budget=28 * 1024 * 1024, vmem_limit=48 * 1024 * 1024,
                tm_cap=512, tn_cap=2048, tk_cap=1024)


_MM_CFG = _tpu_mm_config()


# -----------------------------------------------------------------------------
# Fused batched matmul Pallas kernels (hot path for every conv / linear)
# -----------------------------------------------------------------------------
def _mm_single_kernel(a_ref, b_ref, bias_ref, slope_ref, o_ref):
    # Single K step: no accumulator round-trip, dot + epilogue straight to output.
    y = jnp.dot(a_ref[0], b_ref[0], preferred_element_type=jnp.float32) + bias_ref[0]
    o_ref[0] = jnp.where(y >= 0.0, y, y * slope_ref[0]).astype(o_ref.dtype)


def _mm_single_res_kernel(a_ref, b_ref, bias_ref, slope_ref, res_ref, o_ref):
    y = (jnp.dot(a_ref[0], b_ref[0], preferred_element_type=jnp.float32)
         + bias_ref[0] + res_ref[0].astype(jnp.float32))
    o_ref[0] = jnp.where(y >= 0.0, y, y * slope_ref[0]).astype(o_ref.dtype)


def _mm_acc_kernel(a_ref, b_ref, bias_ref, slope_ref, o_ref, acc_ref):
    @pl.when(pl.program_id(3) == 0)
    def _():
        acc_ref[...] = jnp.zeros_like(acc_ref)

    acc_ref[...] += jnp.dot(a_ref[0], b_ref[0], preferred_element_type=jnp.float32)

    @pl.when(pl.program_id(3) == pl.num_programs(3) - 1)
    def _():
        y = acc_ref[...] + bias_ref[0]
        o_ref[0] = jnp.where(y >= 0.0, y, y * slope_ref[0]).astype(o_ref.dtype)


def _mm_acc_res_kernel(a_ref, b_ref, bias_ref, slope_ref, res_ref, o_ref, acc_ref):
    @pl.when(pl.program_id(3) == 0)
    def _():
        acc_ref[...] = jnp.zeros_like(acc_ref)

    acc_ref[...] += jnp.dot(a_ref[0], b_ref[0], preferred_element_type=jnp.float32)

    @pl.when(pl.program_id(3) == pl.num_programs(3) - 1)
    def _():
        y = acc_ref[...] + bias_ref[0] + res_ref[0].astype(jnp.float32)
        o_ref[0] = jnp.where(y >= 0.0, y, y * slope_ref[0]).astype(o_ref.dtype)


def _round_up(x, m):
    return (x + m - 1) // m * m


def _tile_and_pad(dim, cap, align):
    """Return (tile, padded_dim): tile is aligned and <= cap; padded_dim is a multiple
    of tile.  Prefers an aligned divisor in [cap/2, cap] to avoid zero-pad waste,
    otherwise rounds the dim up to a multiple of the cap."""
    d_al = _round_up(dim, align)
    cap_al = max(align, (cap // align) * align)
    if d_al <= cap_al:
        return d_al, d_al
    t = cap_al
    floor = max(align, cap_al // 2)
    while t >= floor:
        if d_al % t == 0:
            return t, d_al
        t -= align
    return cap_al, _round_up(d_al, cap_al)


def _pick_tiles(M, N, K, res_itemsize):
    """Aligned tiles under the double-buffered VMEM footprint budget."""
    tm_cap, tn_cap, tk_cap = _MM_CFG["tm_cap"], _MM_CFG["tn_cap"], _MM_CFG["tk_cap"]
    budget = _MM_CFG["budget"]
    while True:
        tm, Mp = _tile_and_pad(M, tm_cap, 16)     # bf16 packs 16 rows / sublane group
        tn, Np = _tile_and_pad(N, tn_cap, 128)    # lane-dense output stores
        tk, Kp = _tile_and_pad(K, tk_cap, 128)
        fp = (2 * 2 * (tm * tk + tk * tn + tm * tn)   # bf16 A, B, out (double-buffered)
              + 2 * res_itemsize * tm * tn            # residual (double-buffered)
              + 4 * tm * tn)                          # f32 accumulator scratch
        if fp <= budget or tm_cap <= 16:
            return tm, tn, tk, Mp, Np, Kp
        if tk_cap > 256:
            tk_cap //= 2
        elif tn_cap > 256:
            tn_cap //= 2
        else:
            tm_cap //= 2


def fused_matmul(a, b, bias=None, slope=None, residual=None, out_dtype=jnp.bfloat16):
    """Batched fused matmul:  out[g] = act(a[g] @ b[g] + bias[g] (+ residual[g])).

    a: (G, M, K);  b: (G, K, N);  bias / slope: (G, N) (or (N,) when G == 1) or None;
    residual: (G, M, N) in any float dtype (added in f32) or None.
    """
    f32 = jnp.float32
    G, M, K = a.shape
    Gb, Kb, N = b.shape
    assert Gb == G and Kb == K

    bias = (jnp.zeros((G, 1, N), f32) if bias is None
            else bias.astype(f32).reshape(G, 1, N))
    slope = (jnp.ones((G, 1, N), f32) if slope is None
             else slope.astype(f32).reshape(G, 1, N))

    res_isz = 0 if residual is None else jnp.dtype(residual.dtype).itemsize
    tm, tn, tk, Mp, Np, Kp = _pick_tiles(M, N, K, res_isz)

    a_p = a.astype(jnp.bfloat16)
    b_p = b.astype(jnp.bfloat16)
    if (Mp, Kp) != (M, K):
        a_p = jnp.pad(a_p, ((0, 0), (0, Mp - M), (0, Kp - K)))
    if (Kp, Np) != (K, N):
        b_p = jnp.pad(b_p, ((0, 0), (0, Kp - K), (0, Np - N)))
    if Np != N:
        bias = jnp.pad(bias, ((0, 0), (0, 0), (0, Np - N)))
        slope = jnp.pad(slope, ((0, 0), (0, 0), (0, Np - N)), constant_values=1.0)
    res_p = None
    if residual is not None:
        res_p = residual
        if (Mp, Np) != (M, N):
            res_p = jnp.pad(res_p, ((0, 0), (0, Mp - M), (0, Np - N)))

    k_steps = Kp // tk
    args = [a_p, b_p, bias, slope]

    if k_steps == 1:
        # Fast path (all 1x1 convs with K <= tk): no accumulator, 3-axis grid.
        grid = (G, Mp // tm, Np // tn)
        in_specs = [pl.BlockSpec((1, tm, tk), lambda g, i, j: (g, i, 0)),
                    pl.BlockSpec((1, tk, tn), lambda g, i, j: (g, 0, j)),
                    pl.BlockSpec((1, 1, tn), lambda g, i, j: (g, 0, j)),
                    pl.BlockSpec((1, 1, tn), lambda g, i, j: (g, 0, j))]
        out_spec = pl.BlockSpec((1, tm, tn), lambda g, i, j: (g, i, j))
        kernel = _mm_single_kernel
        if res_p is not None:
            in_specs.append(pl.BlockSpec((1, tm, tn), lambda g, i, j: (g, i, j)))
            args.append(res_p)
            kernel = _mm_single_res_kernel
        scratch = []
        semantics = ("parallel", "parallel", "parallel")
    else:
        grid = (G, Mp // tm, Np // tn, k_steps)     # reduction axis last
        in_specs = [pl.BlockSpec((1, tm, tk), lambda g, i, j, k: (g, i, k)),
                    pl.BlockSpec((1, tk, tn), lambda g, i, j, k: (g, k, j)),
                    pl.BlockSpec((1, 1, tn), lambda g, i, j, k: (g, 0, j)),
                    pl.BlockSpec((1, 1, tn), lambda g, i, j, k: (g, 0, j))]
        out_spec = pl.BlockSpec((1, tm, tn), lambda g, i, j, k: (g, i, j))
        kernel = _mm_acc_kernel
        if res_p is not None:
            in_specs.append(pl.BlockSpec((1, tm, tn), lambda g, i, j, k: (g, i, j)))
            args.append(res_p)
            kernel = _mm_acc_res_kernel
        scratch = [pltpu.VMEM((tm, tn), jnp.float32)]
        semantics = ("parallel", "parallel", "parallel", "arbitrary")

    out = pl.pallas_call(
        kernel,
        out_shape=jax.ShapeDtypeStruct((G, Mp, Np), out_dtype),
        grid_spec=pltpu.PrefetchScalarGridSpec(
            num_scalar_prefetch=0,
            grid=grid,
            in_specs=in_specs,
            out_specs=out_spec,
            scratch_shapes=scratch),
        compiler_params=pltpu.CompilerParams(
            dimension_semantics=semantics,
            vmem_limit_bytes=_MM_CFG["vmem_limit"]),
    )(*args)

    if (Mp, Np) != (M, N):
        out = out[:, :M, :N]
    return out


# -----------------------------------------------------------------------------
# Conv / upsample glue (all heavy math goes through fused_matmul, all in bf16)
# -----------------------------------------------------------------------------
def _im2col(x, kh, kw, stride, padding):
    """x: (N,H,W,C) -> (N*Ho*Wo, kh*kw*C), stays in x.dtype (bf16 feature maps)."""
    N, H, W, C = x.shape
    Ho = (H + 2 * padding - kh) // stride + 1
    Wo = (W + 2 * padding - kw) // stride + 1
    if kh == 1 and kw == 1 and padding == 0:
        return x[:, ::stride, ::stride, :].reshape(N * Ho * Wo, C), Ho, Wo
    xp = jnp.pad(x, ((0, 0), (padding, padding), (padding, padding), (0, 0)))
    cols = []
    for i in range(kh):
        for j in range(kw):
            cols.append(xp[:, i:i + (Ho - 1) * stride + 1:stride,
                           j:j + (Wo - 1) * stride + 1:stride, :])
    a = jnp.concatenate(cols, axis=-1).reshape(N * Ho * Wo, kh * kw * C)
    return a, Ho, Wo


def conv2d_fused(x, w_hwio, stride, padding, bias, slope, residual=None,
                 out_dtype=jnp.bfloat16):
    """x: (B,H,W,Cin), w_hwio: (kh,kw,Cin,Cout) -> (B,Ho,Wo,Cout)."""
    B, H, W, C = x.shape
    kh, kw, cin, cout = w_hwio.shape
    a, Ho, Wo = _im2col(x, kh, kw, stride, padding)
    res = None if residual is None else residual.reshape(1, B * Ho * Wo, cout)
    y = fused_matmul(a[None], w_hwio.reshape(1, kh * kw * cin, cout),
                     bias=bias, slope=slope, residual=res, out_dtype=out_dtype)
    return y.reshape(B, Ho, Wo, cout)


def conv2d_grouped(x, w, stride, padding, bias, slope):
    """Per-head input x:(G,B,H,W,Cin), per-head weights w:(G,kh,kw,Cin,Cout)."""
    G, B, H, W, C = x.shape
    _, kh, kw, cin, cout = w.shape
    a, Ho, Wo = _im2col(x.reshape(G * B, H, W, C), kh, kw, stride, padding)
    a = a.reshape(G, B * Ho * Wo, kh * kw * C)
    y = fused_matmul(a, w.reshape(G, kh * kw * cin, cout), bias=bias, slope=slope)
    return y.reshape(G, B, Ho, Wo, cout)


def _lin_interp_weights(n_in, n_out):
    """align_corners=True 1-D bilinear gather indices + fractions (static numpy)."""
    if n_out == 1:
        src = np.zeros((1,), np.float64)
    else:
        src = np.arange(n_out, dtype=np.float64) * (n_in - 1) / (n_out - 1)
    lo = np.clip(np.floor(src).astype(np.int32), 0, n_in - 1)
    hi = np.minimum(lo + 1, n_in - 1)
    frac = (src - lo).astype(np.float32)
    return lo, hi, frac


def bilinear_upsample(x, h_out, w_out):
    """F.interpolate(mode='bilinear', align_corners=True). x: (B,H,W,C), C stays last
    (lane-dense); pure VPU lerp fused by XLA — no transposes, no skinny matmuls."""
    B, H, W, C = x.shape
    lo_h, hi_h, fh = _lin_interp_weights(H, h_out)
    lo_w, hi_w, fw = _lin_interp_weights(W, w_out)
    fh = jnp.asarray(fh)[None, :, None, None]
    fw = jnp.asarray(fw)[None, None, :, None]
    x = x.astype(jnp.float32)
    xh = x[:, lo_h, :, :] * (1.0 - fh) + x[:, hi_h, :, :] * fh
    y = xh[:, :, lo_w, :] * (1.0 - fw) + xh[:, :, hi_w, :] * fw
    return y                                            # f32 residual (no bf16 drop)


# -----------------------------------------------------------------------------
# Deterministic parameter construction (BN folded at init, weights stored as bf16)
# -----------------------------------------------------------------------------
class ParamGen:
    def __init__(self, seed):
        self._key = jax.random.PRNGKey(seed)

    def _next(self):
        self._key, sub = jax.random.split(self._key)
        return sub

    def conv(self, kh, kw, cin, cout):
        std = math.sqrt(2.0 / (kh * kw * cin))
        return std * jax.random.normal(self._next(), (kh, kw, cin, cout), jnp.float32)

    def vec(self, n, mean=0.0, std=0.0):
        if std == 0.0:
            return jnp.full((n,), mean, jnp.float32)
        return mean + std * jax.random.normal(self._next(), (n,), jnp.float32)

    def bn(self, n):
        return dict(gamma=self.vec(n, 1.0, 0.05), beta=self.vec(n, 0.0, 0.05),
                    mean=self.vec(n, 0.0, 0.05), var=jnp.abs(self.vec(n, 1.0, 0.05)))

    def conv_bn_folded(self, kh, kw, cin, cout, eps=1e-5):
        # TODO(synk): PyTorch module does not pin train/eval; eval-mode BatchNorm is
        # folded into the conv weight/bias here (inference semantics).
        w = self.conv(kh, kw, cin, cout)
        bn = self.bn(cout)
        scale = bn["gamma"] / jnp.sqrt(bn["var"] + eps)
        bias = bn["beta"] - bn["mean"] * scale
        return (w * scale).astype(jnp.bfloat16), bias

    def linear(self, cin, cout):
        return jax.random.normal(self._next(), (cout, cin), jnp.float32)


def resnet152_body_specs():
    """Flat list of the 50 Bottleneck specs of torchvision resnet152 (layers 3/8/36/3)."""
    specs = []
    inplanes = 64
    for planes, blocks, stride in ((64, 3, 1), (128, 8, 2), (256, 36, 2), (512, 3, 2)):
        for b in range(blocks):
            s = stride if b == 0 else 1
            ds = (b == 0) and (s != 1 or inplanes != planes * 4)
            specs.append((inplanes, planes, planes * 4, s, ds))
            inplanes = planes * 4
    return specs


def init_bottleneck(pg, cin, width, cout, downsample):
    p = {}
    p["w1"], p["b1"] = pg.conv_bn_folded(1, 1, cin, width)
    p["w2"], p["b2"] = pg.conv_bn_folded(3, 3, width, width)
    p["w3"], p["b3"] = pg.conv_bn_folded(1, 1, width, cout)
    if downsample:
        p["wd"], p["bd"] = pg.conv_bn_folded(1, 1, cin, cout)
    return p


def init_style_group(pg, n_heads, in_c, out_c, spatial):
    # TODO(synk): Map2StyleBlock / EqualLinear are not defined in the provided source;
    # implemented with pSp GradualStyleBlock semantics (stride-2 3x3 convs + LeakyReLU
    # down to 1x1, then EqualLinear with 1/sqrt(in) weight scale).
    num_pools = int(np.log2(spatial))
    n_convs = 1 + max(0, num_pools - 1)
    # First conv sees the SHARED feature map: fold the head axis into N so all heads
    # run as one wide matmul (K, G*out_c) and the big im2col streams from HBM once.
    w0 = jnp.stack([pg.conv(3, 3, in_c, out_c).reshape(9 * in_c, out_c)
                    for _ in range(n_heads)], axis=1)            # (K, G, out_c)
    w0 = w0.reshape(9 * in_c, n_heads * out_c).astype(jnp.bfloat16)
    b0 = jnp.stack([pg.vec(out_c, 0.0, 0.01)
                    for _ in range(n_heads)]).reshape(n_heads * out_c)
    convs = []
    for _ in range(1, n_convs):                                  # per-head inputs
        w = jnp.stack([pg.conv(3, 3, out_c, out_c) for _ in range(n_heads)]).astype(jnp.bfloat16)
        b = jnp.stack([pg.vec(out_c, 0.0, 0.01) for _ in range(n_heads)])
        convs.append((w, b))
    eq_scale = 1.0 / math.sqrt(out_c)
    lin_w = jnp.stack([pg.linear(out_c, out_c) for _ in range(n_heads)])       # (G,cout,cin)
    lin_w = (jnp.transpose(lin_w, (0, 2, 1)) * eq_scale).astype(jnp.bfloat16)  # (G,K,N)
    lin_b = jnp.zeros((n_heads, out_c), jnp.float32)
    return dict(conv0=(w0, b0), convs=convs, lin_w=lin_w, lin_b=lin_b)


MID_START, FINE_START = 3, 7


def init_encoder(pg, in_channel, size, n_styles):
    params = {}
    params["conv_1_w"], params["conv_1_b"] = pg.conv_bn_folded(3, 3, in_channel, 64)
    params["prelu_1"] = jnp.full((64,), 0.25, jnp.float32)   # nn.PReLU(64) init
    params["body"] = [(s, init_bottleneck(pg, cin, w, cout, ds))
                      for (cin, w, cout, s, ds) in resnet152_body_specs()]
    group_defs = [(MID_START, size / 16),
                  (FINE_START - MID_START, size / 8),
                  (n_styles - FINE_START, size / 4)]
    params["style_groups"] = [init_style_group(pg, n, 2048, 512, sp)
                              for n, sp in group_defs]
    params["trans_conv_1"] = (pg.conv(1, 1, 512, 2048).astype(jnp.bfloat16),
                              pg.vec(2048, 0.0, 0.01))
    params["trans_conv_2"] = (pg.conv(1, 1, 1024, 2048).astype(jnp.bfloat16),
                              pg.vec(2048, 0.0, 0.01))
    return params


# -----------------------------------------------------------------------------
# Jitted forward pieces (jit cache dedupes the 8 unique bottleneck shapes)
# -----------------------------------------------------------------------------
@jax.jit
def _stem_forward(x, w, b, prelu):
    return conv2d_fused(x, w, 2, 1, b, prelu)                       # conv+BN+PReLU fused


@partial(jax.jit, static_argnames=("stride",))
def bottleneck_forward(x, p, *, stride):
    width = p["w1"].shape[-1]
    cout = p["w3"].shape[-1]
    relu_w = jnp.zeros((width,), jnp.float32)                        # slope 0 -> ReLU
    relu_c = jnp.zeros((cout,), jnp.float32)
    out = conv2d_fused(x, p["w1"], 1, 0, p["b1"], relu_w)
    out = conv2d_fused(out, p["w2"], stride, 1, p["b2"], relu_w)
    if "wd" in p:
        identity = conv2d_fused(x, p["wd"], stride, 0, p["bd"], None)
    else:
        identity = x
    # conv3 + BN + residual add + ReLU, all fused in the kernel epilogue
    return conv2d_fused(out, p["w3"], 1, 0, p["b3"], relu_c, residual=identity)


@jax.jit
def _skip_fuse(fm_low, fm_high, w, b):
    """upsample(fm_low -> fm_high size) + trans_conv(fm_high): add fused as f32 residual."""
    up = bilinear_upsample(fm_low, fm_high.shape[1], fm_high.shape[2])
    return conv2d_fused(fm_high, w, 1, 0, b, None, residual=up)


@jax.jit
def styles_group_forward(x, gp):
    """x: (B,H,W,2048) shared feature map; returns (B, n_heads, 512) f32 latents."""
    w0, b0 = gp["conv0"]
    G, out_c = gp["lin_w"].shape[0], gp["lin_w"].shape[-1]
    B = x.shape[0]
    # First conv: head axis folded into N -> single wide matmul, A streamed once.
    a, Ho, Wo = _im2col(x, 3, 3, 2, 1)
    h = fused_matmul(a[None], w0[None], bias=b0,
                     slope=jnp.full((G * out_c,), 0.01, jnp.float32))  # (1,M,G*out_c)
    h = h.reshape(B, Ho, Wo, G, out_c)
    h = jnp.transpose(h, (3, 0, 1, 2, 4))                            # (G,B,Ho,Wo,out_c)
    leaky = jnp.full((G, out_c), 0.01, jnp.float32)
    for w, b in gp["convs"]:
        h = conv2d_grouped(h, w, 2, 1, b, leaky)                     # per-head inputs
    h = h.reshape(G, B, out_c)                                       # spatial is 1x1 here
    lat = fused_matmul(h, gp["lin_w"], bias=gp["lin_b"], out_dtype=jnp.float32)
    return jnp.transpose(lat, (1, 0, 2))                             # (B, G, 512)


# -----------------------------------------------------------------------------
# ResNet152_StyleEncoder forward
# -----------------------------------------------------------------------------
def encoder_forward(params, x_nchw):
    x = jnp.transpose(x_nchw, (0, 2, 3, 1)).astype(jnp.float32)      # NCHW -> NHWC
    x = _stem_forward(x, params["conv_1_w"], params["conv_1_b"], params["prelu_1"])

    fm_1 = fm_2 = fm_3 = None
    for idx, (stride, bp) in enumerate(params["body"]):
        x = bottleneck_forward(x, bp, stride=stride)
        if idx == 9:
            fm_1 = x
        elif idx == 46:
            fm_2 = x
        elif idx == 49:
            fm_3 = x

    latents = [styles_group_forward(fm_3, params["style_groups"][0])]

    w, b = params["trans_conv_2"]
    plus_2 = _skip_fuse(fm_3, fm_2, w, b)
    latents.append(styles_group_forward(plus_2, params["style_groups"][1]))

    w, b = params["trans_conv_1"]
    plus_1 = _skip_fuse(plus_2, fm_1, w, b)
    latents.append(styles_group_forward(plus_1, params["style_groups"][2]))

    return jnp.concatenate(latents, axis=1)                          # (B, n_styles, 512)


if __name__ == "__main__":
    B, IN_CHANNEL, SIZE, N_STYLES = 2, 6, 16, 18   # small spatial size, full channel config

    params = init_encoder(ParamGen(1), IN_CHANNEL, SIZE, N_STYLES)
    x = jax.random.normal(jax.random.PRNGKey(0), (B, IN_CHANNEL, SIZE, SIZE), jnp.float32)

    out = encoder_forward(params, x)
    out = jax.block_until_ready(out)

    assert out.shape == (B, N_STYLES, 512), out.shape
    assert bool(jnp.all(jnp.isfinite(out)))
    print("KERNEL_OK")
</pallas_src>

<mosaic_0001>
module attributes {stable_mosaic.version = 11 : i64} {
  func.func @_mm_single_kernel(%arg0: i32, %arg1: i32, %arg2: i32, %arg3: memref<1x128x128xbf16, #tpu.memory_space<vmem>>, %arg4: memref<1x128x128xbf16, #tpu.memory_space<vmem>>, %arg5: memref<1x1x128xf32, #tpu.memory_space<vmem>>, %arg6: memref<1x1x128xf32, #tpu.memory_space<vmem>>, %arg7: memref<1x128x128xbf16, #tpu.memory_space<vmem>>) attributes {dimension_semantics = [#tpu.dimension_semantics<parallel>, #tpu.dimension_semantics<parallel>, #tpu.dimension_semantics<parallel>], iteration_bounds = array<i64: 1, 1, 1>, scalar_prefetch = 0 : i64, scratch_operands = 0 : i64, tpu.core_type = #tpu.core_type<tc>, window_params = [{transform_indices = @transform_0, window_bounds = array<i64: 1, 128, 128>}, {transform_indices = @transform_1, window_bounds = array<i64: 1, 128, 128>}, {transform_indices = @transform_2, window_bounds = array<i64: 1, 1, 128>}, {transform_indices = @transform_3, window_bounds = array<i64: 1, 1, 128>}, {transform_indices = @transform_4, window_bounds = array<i64: 1, 128, 128>}]} {
    %c0 = arith.constant 0 : index
    %c0_0 = arith.constant 0 : index
    %c0_1 = arith.constant 0 : index
    %0 = vector.load %arg3[%c0, %c0_0, %c0_1] : memref<1x128x128xbf16, #tpu.memory_space<vmem>>, vector<1x128x128xbf16>
    %1 = vector.shape_cast %0 : vector<1x128x128xbf16> to vector<128x128xbf16>
    %c0_2 = arith.constant 0 : index
    %c0_3 = arith.constant 0 : index
    %c0_4 = arith.constant 0 : index
    %2 = vector.load %arg4[%c0_2, %c0_3, %c0_4] : memref<1x128x128xbf16, #tpu.memory_space<vmem>>, vector<1x128x128xbf16>
    %3 = vector.shape_cast %2 : vector<1x128x128xbf16> to vector<128x128xbf16>
    %cst = arith.constant dense<0.000000e+00> : vector<128x128xf32>
    %4 = tpu.matmul %1, %3, %cst {dimension_numbers = #tpu.dot_dimension_numbers<[1], [0], [0], [1], [0, 0, 1, 1], [], []>} : vector<128x128xbf16>, vector<128x128xbf16>, vector<128x128xf32> -> vector<128x128xf32>
    %c0_5 = arith.constant 0 : index
    %c0_6 = arith.constant 0 : index
    %c0_7 = arith.constant 0 : index
    %5 = vector.load %arg5[%c0_5, %c0_6, %c0_7] : memref<1x1x128xf32, #tpu.memory_space<vmem>>, vector<1x1x128xf32>
    %6 = vector.shape_cast %5 : vector<1x1x128xf32> to vector<1x128xf32>
    %7 = vector.broadcast %6 : vector<1x128xf32> to vector<128x128xf32>
    %8 = arith.addf %4, %7 : vector<128x128xf32>
    %cst_8 = arith.constant 0.000000e+00 : f32
    %9 = vector.broadcast %cst_8 : f32 to vector<128x128xf32>
    %10 = arith.cmpf oge, %8, %9 : vector<128x128xf32>
    %c0_9 = arith.constant 0 : index
    %c0_10 = arith.constant 0 : index
    %c0_11 = arith.constant 0 : index
    %11 = vector.load %arg6[%c0_9, %c0_10, %c0_11] : memref<1x1x128xf32, #tpu.memory_space<vmem>>, vector<1x1x128xf32>
    %12 = vector.shape_cast %11 : vector<1x1x128xf32> to vector<1x128xf32>
    %13 = vector.broadcast %12 : vector<1x128xf32> to vector<128x128xf32>
    %14 = arith.mulf %8, %13 : vector<128x128xf32>
    %15 = arith.select %10, %8, %14 : vector<128x128xi1>, vector<128x128xf32>
    %16 = arith.truncf %15 : vector<128x128xf32> to vector<128x128xbf16>
    %c0_12 = arith.constant 0 : index
    %c0_13 = arith.constant 0 : index
    %c0_14 = arith.constant 0 : index
    %17 = vector.load %arg7[%c0_12, %c0_13, %c0_14] : memref<1x128x128xbf16, #tpu.memory_space<vmem>>, vector<1x128x128xbf16>
    %18 = vector.shape_cast %17 : vector<1x128x128xbf16> to vector<128x128xbf16>
    %19 = vector.shape_cast %16 : vector<128x128xbf16> to vector<1x128x128xbf16>
    tpu.vector_store %arg7[%c0_12, %c0_13, %c0_14], %19 {strides = array<i32>} : memref<1x128x128xbf16, #tpu.memory_space<vmem>>, vector<1x128x128xbf16>,
    return
  }
  func.func @transform_0(%arg0: i32, %arg1: i32, %arg2: i32) -> (i32, i32, i32) {
    %c0_i32 = arith.constant 0 : i32
    %c0_i32_0 = arith.constant 0 : i32
    return %arg0, %arg1, %c0_i32 : i32, i32, i32
  }
  func.func @transform_1(%arg0: i32, %arg1: i32, %arg2: i32) -> (i32, i32, i32) {
    %c0_i32 = arith.constant 0 : i32
    %c0_i32_0 = arith.constant 0 : i32
    return %arg0, %c0_i32, %arg2 : i32, i32, i32
  }
  func.func @transform_2(%arg0: i32, %arg1: i32, %arg2: i32) -> (i32, i32, i32) {
    %c0_i32 = arith.constant 0 : i32
    %c0_i32_0 = arith.constant 0 : i32
    return %arg0, %c0_i32, %arg2 : i32, i32, i32
  }
  func.func @transform_3(%arg0: i32, %arg1: i32, %arg2: i32) -> (i32, i32, i32) {
    %c0_i32 = arith.constant 0 : i32
    %c0_i32_0 = arith.constant 0 : i32
    return %arg0, %c0_i32, %arg2 : i32, i32, i32
  }
  func.func @transform_4(%arg0: i32, %arg1: i32, %arg2: i32) -> (i32, i32, i32) {
    %c0_i32 = arith.constant 0 : i32
    return %arg0, %arg1, %arg2 : i32, i32, i32
  }
}

</mosaic_0001>

<bundles_post_ra>
// kernel: _stem_forward.1
= control target key start
LH: loop header
LB: loop body
LE: loop exit
PB: predicated region body
PF: predicated region fallthrough
CT: control target
= control target key end

     0   :  { %s731_s0 = inlined_call_operand.vmem [shape: bf16[1,128,128], index: 0, kind: input, shape index: {}]   ;;  %s732_s1 = inlined_call_operand.vmem [shape: bf16[1,128,128], index: 1, kind: input, shape index: {}]   ;;  %s733_s2 = inlined_call_operand.vmem [shape: f32[1,1,128], index: 2, kind: input, shape index: {}]   ;;  %s734_s3 = inlined_call_operand.vmem [shape: f32[1,1,128], index: 3, kind: input, shape index: {}]   ;;  %s735_s4 = inlined_call_operand.hbm [shape: bf16[1,128,128], index: 4, kind: output, shape index: {}]  }
   0x1   :  { %v566_v0 = vld [vmem:[%s732_s1 + $0x38] sm:$0xff]   ;;  %v567_v1 = vld [vmem:[%s732_s1 + $0x30] sm:$0xff]   ;;  %v568_v2 = vld [vmem:[%s732_s1 + $0x28] sm:$0xff]  }
   0x2   :  { %515 = vmatprep.subr.bf16.mxu0 %v566_v0  ;;  %547 = vmatprep.subr.bf16.mxu1 %v566_v0  ;;  %v569_v3 = vld [vmem:[%s732_s1 + $0x20] sm:$0xff]   ;;  %v570_v6 = vld [vmem:[%s732_s1 + $0x18] sm:$0xff]   ;;  %v571_v7 = vld [vmem:[%s732_s1 + $0x10] sm:$0xff]  }
   0x3   :  { %516 = vmatpush3.bf16.msra.mxu0 %v566_v0  ;;  %555 = vmatpush3.bf16.msra.mxu1 %v566_v0  ;;  %v574_v4 = vld [vmem:[%s731_s0] sm:$0xff]  }
   0x4   :  { %517 = vmatprep.subr.bf16.mxu0 %v567_v1  ;;  %548 = vmatprep.subr.bf16.mxu1 %v567_v1  ;;  %v575_v5 = vld [vmem:[%s731_s0 + $0x20] sm:$0xff]  }
   0x5   :  { %531 = vmatprep.mubr.bf16.mxu0 %v574_v4  ;;  %539 = vmatprep.mubr.bf16.mxu1 %v575_v5 }
   0x7   :  { %518 = vmatpush3.bf16.msra.mxu0 %v567_v1  ;;  %556 = vmatpush3.bf16.msra.mxu1 %v567_v1 }
   0x8   :  { %519 = vmatprep.subr.bf16.mxu0 %v568_v2  ;;  %549 = vmatprep.subr.bf16.mxu1 %v568_v2 }
   0xb   :  { %520 = vmatpush3.bf16.msra.mxu0 %v568_v2  ;;  %557 = vmatpush3.bf16.msra.mxu1 %v568_v2 }
   0xc   :  { %521 = vmatprep.subr.bf16.mxu0 %v569_v3  ;;  %550 = vmatprep.subr.bf16.mxu1 %v569_v3 }
   0xf   :  { %522 = vmatpush3.bf16.msra.mxu0 %v569_v3  ;;  %558 = vmatpush3.bf16.msra.mxu1 %v569_v3 }
  0x10   :  { %523 = vmatprep.subr.bf16.mxu0 %v570_v6  ;;  %551 = vmatprep.subr.bf16.mxu1 %v570_v6 }
  0x11   :  { %9 = vsyncpa [#allocation3], 0  ;;  %v572_v8 = vld [vmem:[%s732_s1 + $0x8] sm:$0xff]   ;;  %v573_v9 = vld [vmem:[%s732_s1] sm:$0xff]  }
  0x12   :  { %v576_v10 = vld [vmem:[%s731_s0 + $0x8] sm:$0xff]   ;;  %v578_v12 = vld [vmem:[%s731_s0 + $0x10] sm:$0xff]   ;;  %v580_v14 = vld [vmem:[%s731_s0 + $0x18] sm:$0xff]  }
  0x13   :  { %524 = vmatpush3.bf16.msra.mxu0 %v570_v6  ;;  %559 = vmatpush3.bf16.msra.mxu1 %v570_v6  ;;  %v577_v11 = vld [vmem:[%s731_s0 + $0x28] sm:$0xff]   ;;  %v579_v13 = vld [vmem:[%s731_s0 + $0x30] sm:$0xff]   ;;  %v581_v15 = vld [vmem:[%s731_s0 + $0x38] sm:$0xff]   ;;  %s604_s0 = smov [#allocation2]  }
  0x14   :  { %525 = vmatprep.subr.bf16.mxu0 %v571_v7  ;;  %552 = vmatprep.subr.bf16.mxu1 %v571_v7  ;;  %v683_v16 = vld [vmem:[%s733_s2] ss:$0 sm:$0xff]  ;;  %s391_s2 = sshll.u32 %s604_s0, 4  ;;  %s392_s2 = int_to_ptr.vmem [resolvable:$true] %s391_s2 }
  0x15   :  { %v688_v18 = vld [vmem:[%s734_s3] ss:$0 sm:$0xff]  ;;  %s582_s3 = scalar_lea.vmem %s392_s2, 1024  ;;  %p587_p1 = scmp.lt.s32.totalorder %s392_s2, %s392_s2 }
  0x16   :  { %p583_p0 = scmp.ne.s32.totalorder %s392_s2, %s582_s3  ;;  %p588_p2 = scmp.lt.s32.totalorder %s582_s3, %s582_s3 }
  0x17   :  { %526 = vmatpush3.bf16.msra.mxu0 %v571_v7  ;;  %560 = vmatpush3.bf16.msra.mxu1 %v571_v7 }
  0x18   :  { %527 = vmatprep.subr.bf16.mxu0 %v572_v8  ;;  %553 = vmatprep.subr.bf16.mxu1 %v572_v8  ;;  %p589_p3 = por %p588_p2, %p587_p1 }
  0x1a   :  { %p590_p4 = pnand %p589_p3, %p583_p0 }
  0x1b   :  { %528 = vmatpush3.bf16.msra.mxu0 %v572_v8  ;;  %561 = vmatpush3.bf16.msra.mxu1 %v572_v8 }
  0x1c   :  { %529 = vmatprep.subr.bf16.mxu0 %v573_v9  ;;  %554 = vmatprep.subr.bf16.mxu1 %v573_v9 }
  0x1f   :  { %530 = vmatpush3.bf16.msra.mxu0 %v573_v9  ;;  %562 = vmatpush3.bf16.msra.mxu1 %v573_v9 }
  0x22   :  { %532 = vmatmul.mubr.bf16.vlgmr.msra.gmra.mxu0 %v576_v10  ;;  %540 = vmatmul.mubr.bf16.vlgmr.msra.gmra.mxu1 %v577_v11 }
  0x23   :  { %535 = vmatprep.mubr.bf16.mxu0 %v578_v12  ;;  %543 = vmatprep.mubr.bf16.mxu1 %v579_v13 }
  0x2a   :  { %536 = vmatmul.mubr.bf16.gmra.mxu0 %v580_v14  ;;  %544 = vmatmul.mubr.bf16.gmra.mxu1 %v581_v15 }
  0xe2   :  { %v533_v17 = vpop.f32.mrf.mxu0  ;;  %v541_v19 = vpop.f32.mrf.mxu1 }
  0xe3   :  { %v197_v20 = vadd.f32 %v533_v17, %v683_v16  ;;  %v229_v21 = vadd.f32 %v541_v19, %v683_v16 }
  0xe4   :  { %v188_v22 = vpop.f32.mrf.mxu0  ;;  %v220_v23 = vpop.f32.mrf.mxu1 }
  0xe5   :  { %vm253_vm0 = vcmp.ge.f32.partialorder %v197_v20, 0.0  ;;  %v276_v24 = vmul.f32 %v688_v18, %v197_v20  ;;  %vm261_vm1 = vcmp.ge.f32.partialorder %v229_v21, 0.0  ;;  %v284_v25 = vmul.f32 %v688_v18, %v229_v21 }
  0xe6   :  { %v189_v26 = vadd.f32 %v683_v16, %v188_v22  ;;  %v221_v27 = vadd.f32 %v683_v16, %v220_v23  ;;  %v534_v28 = vpop.f32.mrf.mxu0  ;;  %v542_v29 = vpop.f32.mrf.mxu1 }
  0xe7   :  { %v200_v30 = vadd.f32 %v534_v28, %v683_v16  ;;  %v232_v31 = vadd.f32 %v542_v29, %v683_v16  ;;  %v292_v32 = vsel %vm253_vm0, %v197_v20, %v276_v24  ;;  %v300_v33 = vsel %vm261_vm1, %v229_v21, %v284_v25 }
  0xe8   :  { %vm251_vm2 = vcmp.ge.f32.partialorder %v189_v26, 0.0  ;;  %v274_v34 = vmul.f32 %v688_v18, %v189_v26  ;;  %v191_v35 = vpop.f32.mrf.mxu0  ;;  %v223_v36 = vpop.f32.mrf.mxu1  ;;  %vm259_vm5 = vcmp.ge.f32.partialorder %v221_v27, 0.0  ;;  %v282_v39 = vmul.f32 %v688_v18, %v221_v27 }
  0xe9   :  { %vm254_vm3 = vcmp.ge.f32.partialorder %v200_v30, 0.0  ;;  %v277_v37 = vmul.f32 %v688_v18, %v200_v30  ;;  %vm262_vm4 = vcmp.ge.f32.partialorder %v232_v31, 0.0  ;;  %v285_v38 = vmul.f32 %v688_v18, %v232_v31 }
  0xea   :  { %v192_v40 = vadd.f32 %v683_v16, %v191_v35  ;;  %v224_v41 = vadd.f32 %v683_v16, %v223_v36  ;;  %v537_v42 = vpop.f32.mrf.mxu0  ;;  %v545_v43 = vpop.f32.mrf.mxu1  ;;  %v290_v54 = vsel %vm251_vm2, %v189_v26, %v274_v34  ;;  %v298_v59 = vsel %vm259_vm5, %v221_v27, %v282_v39 }
  0xeb   :  { %v293_v44 = vsel %vm254_vm3, %v200_v30, %v277_v37  ;;  %v301_v45 = vsel %vm262_vm4, %v232_v31, %v285_v38  ;;  %v213_v46 = vadd.f32 %v537_v42, %v683_v16  ;;  %v245_v47 = vadd.f32 %v545_v43, %v683_v16 }
  0xec   :  { %v460_v48 = vpack.c.bf16 %v293_v44, %v292_v32  ;;  %v480_v49 = vpack.c.bf16 %v301_v45, %v300_v33  ;;  %vm252_vm6 = vcmp.ge.f32.partialorder %v192_v40, 0.0  ;;  %v275_v50 = vmul.f32 %v688_v18, %v192_v40  ;;  %v204_v51 = vpop.f32.mrf.mxu0  ;;  %v236_v52 = vpop.f32.mrf.mxu1 }
  0xed   :  { %vm260_vm7 = vcmp.ge.f32.partialorder %v224_v41, 0.0  ;;  %v283_v53 = vmul.f32 %v688_v18, %v224_v41  ;;  %v205_v56 = vadd.f32 %v683_v16, %v204_v51  ;;  %v237_v62 = vadd.f32 %v683_v16, %v236_v52 }
  0xee   :  { %492 = vst [vmem:[#allocation2 + $0x8] sm:$0xff] %v460_v48   ;;  %496 = vst [vmem:[#allocation2 + $0x28] sm:$0xff] %v480_v49   ;;  %v291_v55 = vsel %vm252_vm6, %v192_v40, %v275_v50  ;;  %v538_v57 = vpop.f32.mrf.mxu0  ;;  %v546_v58 = vpop.f32.mrf.mxu1  ;;  %vm257_vm8 = vcmp.ge.f32.partialorder %v213_v46, 0.0  ;;  %v280_v0 = vmul.f32 %v688_v18, %v213_v46  ;;  %vm265_vm9 = vcmp.ge.f32.partialorder %v245_v47, 0.0 }
  0xef   :  { %v455_v60 = vpack.c.bf16 %v291_v55, %v290_v54  ;;  %v299_v61 = vsel %vm260_vm7, %v224_v41, %v283_v53  ;;  %v288_v3 = vmul.f32 %v688_v18, %v245_v47  ;;  %vm255_vm10 = vcmp.ge.f32.partialorder %v205_v56, 0.0 }
  0xf0   :  { %v475_v63 = vpack.c.bf16 %v299_v61, %v298_v59  ;;  %v207_v1 = vpop.f32.mrf.mxu0  ;;  %v239_v2 = vpop.f32.mrf.mxu1  ;;  %v216_v4 = vadd.f32 %v538_v57, %v683_v16  ;;  %v248_v5 = vadd.f32 %v546_v58, %v683_v16  ;;  %v278_v6 = vmul.f32 %v688_v18, %v205_v56 }
  0xf1   :  { %456 = vst [vmem:[#allocation2] sm:$0xff] %v455_v60   ;;  %vm263_vm11 = vcmp.ge.f32.partialorder %v237_v62, 0.0  ;;  %v208_v7 = vadd.f32 %v683_v16, %v207_v1  ;;  %v240_v8 = vadd.f32 %v683_v16, %v239_v2  ;;  %v286_v9 = vmul.f32 %v688_v18, %v237_v62 }
  0xf2   :  { %495 = vst [vmem:[#allocation2 + $0x20] sm:$0xff] %v475_v63   ;;  %vm258_vm12 = vcmp.ge.f32.partialorder %v216_v4, 0.0  ;;  %v281_v10 = vmul.f32 %v688_v18, %v216_v4  ;;  %vm266_vm13 = vcmp.ge.f32.partialorder %v248_v5, 0.0  ;;  %v289_v11 = vmul.f32 %v688_v18, %v248_v5 }
  0xf3   :  { %vm256_vm14 = vcmp.ge.f32.partialorder %v208_v7, 0.0  ;;  %v279_v12 = vmul.f32 %v688_v18, %v208_v7  ;;  %vm264_vm15 = vcmp.ge.f32.partialorder %v240_v8, 0.0  ;;  %v296_v13 = vsel %vm257_vm8, %v213_v46, %v280_v0 }
  0xf4   :  { %v304_v14 = vsel %vm265_vm9, %v245_v47, %v288_v3  ;;  %v297_v15 = vsel %vm258_vm12, %v216_v4, %v281_v10  ;;  %v287_v17 = vmul.f32 %v688_v18, %v240_v8  ;;  %v294_v16 = vsel %vm255_vm10, %v205_v56, %v278_v6 }
  0xf5   :  { %v470_v19 = vpack.c.bf16 %v297_v15, %v296_v13  ;;  %v305_v20 = vsel %vm266_vm13, %v248_v5, %v289_v11  ;;  %v295_v21 = vsel %vm256_vm14, %v208_v7, %v279_v12  ;;  %v302_v22 = vsel %vm263_vm11, %v237_v62, %v286_v9 }
  0xf6   :  { %v490_v23 = vpack.c.bf16 %v305_v20, %v304_v14  ;;  %v465_v24 = vpack.c.bf16 %v295_v21, %v294_v16  ;;  %v303_v25 = vsel %vm264_vm15, %v240_v8, %v287_v17 }
  0xf7   :  { %494 = vst [vmem:[#allocation2 + $0x18] sm:$0xff] %v470_v19   ;;  %v485_v26 = vpack.c.bf16 %v303_v25, %v302_v22 }
  0xf8   :  { %498 = vst [vmem:[#allocation2 + $0x38] sm:$0xff] %v490_v23   ;;  %493 = vst [vmem:[#allocation2 + $0x10] sm:$0xff] %v465_v24  }
  0xf9   :  { %497 = vst [vmem:[#allocation2 + $0x30] sm:$0xff] %v485_v26  }
  0xfa   :  { %593 = shalt.err (!%p590_p4)
}
  0xfb   :  { %s605_s24 = smov 64   ;;  %s606_s25 = smov 4  }
  0xfc   :  { %397 = dma.vmem_to_hbm [thread:$0]  %s392_s2, 1024, %s735_s4, [#allocation3], %s605_s24, %s605_s24, %s606_s25  }
  0xfd   :  { %602 = dma.done.wait [#allocation3], 1024  }
  0xfe   :  { %603 = vsyncadd [#allocation3], 4294966272 }
  0xff   :  { %401 = vsyncpa [#allocation3], 1 }

</bundles_post_ra>
